<compile_context>
chip_gen: v5e
topology: v5e:2x2
jax: 0.10.0
libtpu: 0.0.40
codegen_flags: <defaults>
</compile_context>

<pallas_src>
import math
import functools
import numpy as np
import jax
import jax.numpy as jnp
from jax import lax
from jax.experimental import pallas as pl
from jax.experimental.pallas import tpu as pltpu

# Orthonormal real spherical-harmonic constants (sphericart "normalized" convention).
_C0 = 0.5 * math.sqrt(1.0 / math.pi)
_C1 = math.sqrt(3.0 / (4.0 * math.pi))
_C2A = math.sqrt(15.0 / (4.0 * math.pi))
_C2B = math.sqrt(5.0 / (16.0 * math.pi))
_C2C = math.sqrt(15.0 / (16.0 * math.pi))


def _irrep_dim(l):
    return 2 * l + 1


def _round_up(v, m):
    return ((v + m - 1) // m) * m


class ProductReprMeta:
    """Shape bookkeeping equivalent of bioeq.geom.ProductRepr (KERNEL=0 branch)."""

    def __init__(self, lvals1, lvals2):
        self.lvals1 = list(lvals1)
        self.lvals2 = list(lvals2)
        self.pairs = [(l1, l2) for l1 in self.lvals1 for l2 in self.lvals2]

    def __eq__(self, other):
        return (isinstance(other, ProductReprMeta)
                and self.lvals1 == other.lvals1 and self.lvals2 == other.lvals2)

    def rep1_dim(self):
        return sum(_irrep_dim(l) for l in self.lvals1)

    def rep2_dim(self):
        return sum(_irrep_dim(l) for l in self.lvals2)

    def lmax(self):
        return max(l1 + l2 for l1, l2 in self.pairs)

    def maxdim(self):
        # ProductIrrep.dim() + lmin^2 == (l1 + l2 + 1)^2
        return max((l1 + l2 + 1) ** 2 for l1, l2 in self.pairs)

    def nreps(self):
        return sum(l1 + l2 - abs(l1 - l2) + 1 for l1, l2 in self.pairs)


def build_equivariant_bases(reprs, key):
    """Mirror EquivariantBases.__init__ bookkeeping; coupling buffers are synthetic."""
    unique, repr_ix = [], []
    for r in reprs:
        if r not in unique:
            unique.append(r)
        repr_ix.append(unique.index(r))
    maxdim = max(r.maxdim() for r in unique)
    lmax = max(r.lmax() for r in unique)
    assert maxdim == (lmax + 1) ** 2
    couplings, outdims = [], []
    for i, r in enumerate(unique):
        kcols = r.rep1_dim() * r.nreps() * r.rep2_dim()
        # TODO(synk): exact Clebsch-Gordan couplings (wigners.clebsch_gordan_array +
        # complex->real change of basis) are not reproduced; deterministic synthetic values
        # with the exact buffer shape, and rows >= repr.maxdim() zeroed as in __init__.
        c = jax.random.normal(jax.random.fold_in(key, i), (maxdim, kcols), jnp.float32)
        c = c.at[r.maxdim():].set(0.0)
        couplings.append(c)
        outdims.append((r.rep1_dim(), r.rep2_dim() * r.nreps()))
    return couplings, outdims, repr_ix, maxdim, lmax


def _sh_rows(a, b, c, nsh):
    """Real SH values, one lane-dense row per harmonic.  a/b/c are the original (x0,x1,x2)
    coordinate rows; SphericalHarmonic permutes by [2,0,1] before sphericart, so sphericart
    sees (X, Y, Z) = (c, a, b).  nan -> 0 is handled by the guarded rsqrt (select on r2
    BEFORE the rsqrt, so no inf/nan is ever produced)."""
    X, Y, Z = c, a, b
    r2 = X * X + Y * Y + Z * Z
    valid = r2 > 0
    rinv = jnp.where(valid, lax.rsqrt(jnp.where(valid, r2, 1.0)), 0.0)
    rinv2 = rinv * rinv
    rows = [jnp.full_like(r2, _C0)]                        # l = 0
    if nsh >= 4:                                           # l = 1 : m = -1, 0, +1
        rows += [_C1 * Y * rinv, _C1 * Z * rinv, _C1 * X * rinv]
    if nsh >= 9:                                           # l = 2 : m = -2 .. +2
        rows += [_C2A * X * Y * rinv2,
                 _C2A * Y * Z * rinv2,
                 _C2B * (3.0 * Z * Z - r2) * rinv2,
                 _C2A * X * Z * rinv2,
                 _C2C * (X * X - Y * Y) * rinv2]
    return rows


def _eqbases_kernel(x_ref, *refs, nsh, ngroups):
    # x_ref:           (3, TN)    transposed point tile (lane-dense coordinate rows)
    # refs[:ngroups]:  (nsh, Kg)  per-group coupling matrices (constant index_map, resident)
    # refs[ngroups:]:  (TN, Kg)   per-group output tiles
    coup_refs = refs[:ngroups]
    out_refs = refs[ngroups:]
    x = x_ref[...]
    a = x[0:1, :]
    b = x[1:2, :]
    c = x[2:3, :]
    sh = jnp.concatenate(_sh_rows(a, b, c, nsh), axis=0)            # (nsh, TN)   VPU
    for coup_ref, out_ref in zip(coup_refs, out_refs):
        # Contract over the sublane (nsh) axis directly: sh stays (nsh, TN); any small
        # transpose Mosaic inserts lands on the XLU slot, which has slack here.
        m = lax.dot_general(sh, coup_ref[...],
                            dimension_numbers=(((0,), (0,)), ((), ())),
                            preferred_element_type=jnp.float32)     # (TN, Kg)    MXU
        out_ref[...] = m.astype(out_ref.dtype)


_TARGET_STEP_OUT_BYTES = 4 << 20    # ~4 MiB of output per grid step
_VMEM_OUT_BUDGET = 16 << 20         # cap on 2x-buffered output VMEM (safety only)
_MAX_TN = 8192


def _choose_row_tile(n_rows, k_all):
    """Row tile sized from the total output width: big enough to amortize the ~0.35us/step
    grid overhead against the HBM store, small enough that double-buffered outputs
    (2*TN*k_all*4) stay well inside every generation's default scoped VMEM."""
    row_bytes = max(k_all * 4, 1)
    tn = min(_TARGET_STEP_OUT_BYTES // row_bytes,
             _VMEM_OUT_BUDGET // (2 * row_bytes),
             _MAX_TN)
    # Multi-block tiles must keep the (3, TN) x-block lane-aligned -> multiple of 256.
    tn = max((tn // 256) * 256, 256)
    if _round_up(n_rows, 8) <= tn:
        # Whole problem fits one block: size it exactly (multiple of 8 sublanes) so no block
        # overhangs any array.
        return _round_up(n_rows, 8)
    return tn


def equivariant_bases_forward(x, couplings, outdims, repr_ix, maxdim, *,
                              out_dtype=jnp.float32, core_parallel=False):
    """Equivalent of EquivariantBases.forward.  x: (B, n, 3).

    out_dtype:     jnp.bfloat16 halves the dominant HBM store traffic if downstream can
                   take it (default f32 keeps exact agreement with the reference).
    core_parallel: set True on v7x (2 TensorCores/chip) to split the row grid across both
                   cores; leave False on single-TC v5e/v6e.
    """
    assert maxdim in (1, 4, 9), "analytic SH implemented up to lmax=2 in this demo"
    B, n, _ = x.shape
    N = B * n
    nuniq = len(couplings)
    kcols = [int(c.shape[1]) for c in couplings]

    # Group unique reprs into kernel outputs:
    #   * kcols >= 128: own output ref at exact width -> written to HBM exactly once (only
    #     the tail lane-group of a non-multiple-of-128 width is a masked store).
    #   * kcols  < 128: fused into one output padded to a multiple of 128 (lane-dense store);
    #     the post-kernel column slices only touch these tiny reprs.
    big = [i for i in range(nuniq) if kcols[i] >= 128]
    small = [i for i in range(nuniq) if kcols[i] < 128]
    group_members, group_coups, group_widths = [], [], []
    for i in big:
        group_members.append([i])
        group_coups.append(couplings[i].astype(jnp.float32))
        group_widths.append(kcols[i])
    if small:
        cat = jnp.concatenate([couplings[i].astype(jnp.float32) for i in small], axis=1)
        k_small = int(cat.shape[1])
        k_small_pad = _round_up(k_small, 128)
        group_members.append(list(small))
        group_coups.append(jnp.pad(cat, ((0, 0), (0, k_small_pad - k_small))))
        group_widths.append(k_small_pad)
    ngroups = len(group_coups)

    K_all = sum(group_widths)
    TN = _choose_row_tile(N, K_all)
    n_blocks = (N + TN - 1) // TN
    Npad = n_blocks * TN

    # Transposed, zero-padded points (3, Npad): three contiguous rows for the DMA.  The pad
    # rides on the transpose copy XLA makes anyway (12 bytes/point, negligible vs the
    # >= K_all*4 bytes/point output) and keeps garbage out of the pipeline; the OUTPUT rows
    # are exactly N, so the edge block's store is masked and no row-trim copy exists.
    xT = jnp.pad(x.reshape(N, 3).astype(jnp.float32).T, ((0, 0), (0, Npad - N)))

    in_specs = [pl.BlockSpec((3, TN), lambda i: (0, i))]
    in_specs += [pl.BlockSpec((maxdim, w), lambda i: (0, 0)) for w in group_widths]
    out_specs = tuple(pl.BlockSpec((TN, w), lambda i: (i, 0)) for w in group_widths)
    out_shape = tuple(jax.ShapeDtypeStruct((N, w), out_dtype) for w in group_widths)

    row_sem = pltpu.CORE_PARALLEL if core_parallel else "parallel"
    outs = pl.pallas_call(
        functools.partial(_eqbases_kernel, nsh=maxdim, ngroups=ngroups),
        out_shape=out_shape,
        grid=(n_blocks,),
        in_specs=in_specs,
        out_specs=out_specs,
        compiler_params=pltpu.CompilerParams(dimension_semantics=(row_sem,)),
    )(xT, *group_coups)

    # Un-group into the module's per-repr outputs.  Exact-width (big) groups only need a
    # free contiguous reshape; members of the fused small group need tiny column slices.
    ms = [None] * nuniq
    for members, out in zip(group_members, outs):
        off = 0
        for i in members:
            if int(out.shape[1]) == kcols[i]:
                ms[i] = out.reshape(B, n, *outdims[i])
            else:
                ms[i] = out[:, off:off + kcols[i]].reshape(B, n, *outdims[i])
            off += kcols[i]
    return tuple(ms[i] for i in repr_ix)


def _reference_forward(x, couplings, outdims, repr_ix, maxdim):
    """Pure-JAX reference of the same math for the correctness check."""
    B, n, _ = x.shape
    a, b, c = x[..., 0:1], x[..., 1:2], x[..., 2:3]
    sh = jnp.concatenate(_sh_rows(a, b, c, maxdim), axis=-1)        # (B, n, maxdim)
    sh_r = sh.reshape(-1, maxdim)
    ms = [jnp.dot(sh_r, coup, precision=lax.Precision.HIGHEST).reshape(B, n, *od)
          for coup, od in zip(couplings, outdims)]
    return tuple(ms[i] for i in repr_ix)


if __name__ == "__main__":
    key = jax.random.PRNGKey(0)
    kx, kc = jax.random.split(key)

    # Three unique ProductReprs with lmax <= 2:
    #   pr_a: Repr([0,1])   x Repr([0,1])     -> kcols = 4*6*4  = 96   (small, fused)
    #   pr_b: Repr([0])     x Repr([0,1])     -> kcols = 1*2*4  = 8    (small, fused)
    #   pr_c: Repr([0,1,1]) x Repr([0,1,1])   -> kcols = 7*17*7 = 833  (big, own output)
    # pr_a repeated -> exercises unique-repr dedup / repr_ix.
    pr_a = ProductReprMeta([0, 1], [0, 1])
    pr_b = ProductReprMeta([0], [0, 1])
    pr_c = ProductReprMeta([0, 1, 1], [0, 1, 1])
    reprs = (pr_a, pr_c, pr_b, pr_a)

    couplings, outdims, repr_ix, maxdim, lmax = build_equivariant_bases(reprs, kc)

    B, n = 2, 8
    x = jax.random.normal(kx, (B, n, 3), dtype=jnp.float32)

    outs = equivariant_bases_forward(x, couplings, outdims, repr_ix, maxdim)
    outs = jax.block_until_ready(outs)

    refs = _reference_forward(x, couplings, outdims, repr_ix, maxdim)
    expected_shapes = [(B, n) + outdims[i] for i in repr_ix]
    for o, r, s in zip(outs, refs, expected_shapes):
        assert o.shape == s, (o.shape, s)
        np.testing.assert_allclose(np.asarray(o), np.asarray(r), rtol=1e-4, atol=1e-4)

    print("KERNEL_OK")
</pallas_src>

<mosaic_0001>
module attributes {stable_mosaic.version = 11 : i64} {
  func.func @_eqbases_kernel(%arg0: i32, %arg1: memref<3x16xf32, #tpu.memory_space<vmem>>, %arg2: memref<9x833xf32, #tpu.memory_space<vmem>>, %arg3: memref<9x128xf32, #tpu.memory_space<vmem>>, %arg4: memref<16x833xf32, #tpu.memory_space<vmem>>, %arg5: memref<16x128xf32, #tpu.memory_space<vmem>>) attributes {dimension_semantics = [#tpu.dimension_semantics<parallel>], iteration_bounds = array<i64: 1>, scalar_prefetch = 0 : i64, scratch_operands = 0 : i64, tpu.core_type = #tpu.core_type<tc>, window_params = [{transform_indices = @transform_0, window_bounds = array<i64: 3, 16>}, {pipeline_mode = #tpu.pipeline_mode<synchronous>, transform_indices = @transform_1, window_bounds = array<i64: 9, 833>}, {pipeline_mode = #tpu.pipeline_mode<synchronous>, transform_indices = @transform_2, window_bounds = array<i64: 9, 128>}, {transform_indices = @transform_3, window_bounds = array<i64: 16, 833>}, {transform_indices = @transform_4, window_bounds = array<i64: 16, 128>}]} {
    %c0 = arith.constant 0 : index
    %c0_0 = arith.constant 0 : index
    %0 = vector.load %arg1[%c0, %c0_0] : memref<3x16xf32, #tpu.memory_space<vmem>>, vector<3x16xf32>
    %1 = vector.extract_strided_slice %0 {offsets = [0, 0], sizes = [1, 16], strides = [1, 1]} : vector<3x16xf32> to vector<1x16xf32>
    %2 = vector.extract_strided_slice %0 {offsets = [1, 0], sizes = [1, 16], strides = [1, 1]} : vector<3x16xf32> to vector<1x16xf32>
    %3 = vector.extract_strided_slice %0 {offsets = [2, 0], sizes = [1, 16], strides = [1, 1]} : vector<3x16xf32> to vector<1x16xf32>
    %4 = arith.mulf %3, %3 : vector<1x16xf32>
    %5 = arith.mulf %1, %1 : vector<1x16xf32>
    %6 = arith.addf %4, %5 : vector<1x16xf32>
    %7 = arith.mulf %2, %2 : vector<1x16xf32>
    %8 = arith.addf %6, %7 : vector<1x16xf32>
    %cst = arith.constant 0.000000e+00 : f32
    %9 = vector.broadcast %cst : f32 to vector<1x16xf32>
    %10 = arith.cmpf ogt, %8, %9 : vector<1x16xf32>
    %cst_1 = arith.constant 1.000000e+00 : f32
    %11 = vector.broadcast %cst_1 : f32 to vector<1x16xf32>
    %12 = arith.select %10, %8, %11 : vector<1x16xi1>, vector<1x16xf32>
    %13 = math.rsqrt %12 : vector<1x16xf32>
    %cst_2 = arith.constant 0.000000e+00 : f32
    %14 = vector.broadcast %cst_2 : f32 to vector<1x16xf32>
    %15 = arith.select %10, %13, %14 : vector<1x16xi1>, vector<1x16xf32>
    %16 = arith.mulf %15, %15 : vector<1x16xf32>
    %cst_3 = arith.constant 0.282094806 : f32
    %17 = vector.broadcast %cst_3 : f32 to vector<1x16xf32>
    %cst_4 = arith.constant 0.488602519 : f32
    %18 = vector.broadcast %cst_4 : f32 to vector<1x16xf32>
    %19 = arith.mulf %18, %1 : vector<1x16xf32>
    %20 = arith.mulf %19, %15 : vector<1x16xf32>
    %cst_5 = arith.constant 0.488602519 : f32
    %21 = vector.broadcast %cst_5 : f32 to vector<1x16xf32>
    %22 = arith.mulf %21, %2 : vector<1x16xf32>
    %23 = arith.mulf %22, %15 : vector<1x16xf32>
    %cst_6 = arith.constant 0.488602519 : f32
    %24 = vector.broadcast %cst_6 : f32 to vector<1x16xf32>
    %25 = arith.mulf %24, %3 : vector<1x16xf32>
    %26 = arith.mulf %25, %15 : vector<1x16xf32>
    %cst_7 = arith.constant 1.09254849 : f32
    %27 = vector.broadcast %cst_7 : f32 to vector<1x16xf32>
    %28 = arith.mulf %27, %3 : vector<1x16xf32>
    %29 = arith.mulf %28, %1 : vector<1x16xf32>
    %30 = arith.mulf %29, %16 : vector<1x16xf32>
    %cst_8 = arith.constant 1.09254849 : f32
    %31 = vector.broadcast %cst_8 : f32 to vector<1x16xf32>
    %32 = arith.mulf %31, %1 : vector<1x16xf32>
    %33 = arith.mulf %32, %2 : vector<1x16xf32>
    %34 = arith.mulf %33, %16 : vector<1x16xf32>
    %cst_9 = arith.constant 3.000000e+00 : f32
    %35 = vector.broadcast %cst_9 : f32 to vector<1x16xf32>
    %36 = arith.mulf %35, %2 : vector<1x16xf32>
    %37 = arith.mulf %36, %2 : vector<1x16xf32>
    %38 = arith.subf %37, %8 : vector<1x16xf32>
    %cst_10 = arith.constant 0.31539157 : f32
    %39 = vector.broadcast %cst_10 : f32 to vector<1x16xf32>
    %40 = arith.mulf %39, %38 : vector<1x16xf32>
    %41 = arith.mulf %40, %16 : vector<1x16xf32>
    %cst_11 = arith.constant 1.09254849 : f32
    %42 = vector.broadcast %cst_11 : f32 to vector<1x16xf32>
    %43 = arith.mulf %42, %3 : vector<1x16xf32>
    %44 = arith.mulf %43, %2 : vector<1x16xf32>
    %45 = arith.mulf %44, %16 : vector<1x16xf32>
    %46 = arith.mulf %3, %3 : vector<1x16xf32>
    %47 = arith.mulf %1, %1 : vector<1x16xf32>
    %48 = arith.subf %46, %47 : vector<1x16xf32>
    %cst_12 = arith.constant 0.546274245 : f32
    %49 = vector.broadcast %cst_12 : f32 to vector<1x16xf32>
    %50 = arith.mulf %49, %48 : vector<1x16xf32>
    %51 = arith.mulf %50, %16 : vector<1x16xf32>
    %52 = tpu.concatenate %17, %20, %23, %26, %30, %34, %41, %45, %51 in 0 : vector<1x16xf32>, vector<1x16xf32>, vector<1x16xf32>, vector<1x16xf32>, vector<1x16xf32>, vector<1x16xf32>, vector<1x16xf32>, vector<1x16xf32>, vector<1x16xf32> -> vector<9x16xf32>
    %c0_13 = arith.constant 0 : index
    %c0_14 = arith.constant 0 : index
    %53 = vector.load %arg2[%c0_13, %c0_14] : memref<9x833xf32, #tpu.memory_space<vmem>>, vector<9x833xf32>
    %cst_15 = arith.constant dense<0.000000e+00> : vector<16x833xf32>
    %54 = tpu.matmul %52, %53, %cst_15 {dimension_numbers = #tpu.dot_dimension_numbers<[0], [0], [1], [1], [0, 1, 1, 1], [], []>} : vector<9x16xf32>, vector<9x833xf32>, vector<16x833xf32> -> vector<16x833xf32>
    %c0_16 = arith.constant 0 : index
    %c0_17 = arith.constant 0 : index
    %55 = vector.load %arg4[%c0_16, %c0_17] : memref<16x833xf32, #tpu.memory_space<vmem>>, vector<16x833xf32>
    tpu.vector_store %arg4[%c0_16, %c0_17], %54 {strides = array<i32>} : memref<16x833xf32, #tpu.memory_space<vmem>>, vector<16x833xf32>,
    %c0_18 = arith.constant 0 : index
    %c0_19 = arith.constant 0 : index
    %56 = vector.load %arg3[%c0_18, %c0_19] : memref<9x128xf32, #tpu.memory_space<vmem>>, vector<9x128xf32>
    %cst_20 = arith.constant dense<0.000000e+00> : vector<16x128xf32>
    %57 = tpu.matmul %52, %56, %cst_20 {dimension_numbers = #tpu.dot_dimension_numbers<[0], [0], [1], [1], [0, 1, 1, 1], [], []>} : vector<9x16xf32>, vector<9x128xf32>, vector<16x128xf32> -> vector<16x128xf32>
    %c0_21 = arith.constant 0 : index
    %c0_22 = arith.constant 0 : index
    %58 = vector.load %arg5[%c0_21, %c0_22] : memref<16x128xf32, #tpu.memory_space<vmem>>, vector<16x128xf32>
    tpu.vector_store %arg5[%c0_21, %c0_22], %57 {strides = array<i32>} : memref<16x128xf32, #tpu.memory_space<vmem>>, vector<16x128xf32>,
    return
  }
  func.func @transform_0(%arg0: i32) -> (i32, i32) {
    %c0_i32 = arith.constant 0 : i32
    %c0_i32_0 = arith.constant 0 : i32
    return %c0_i32, %arg0 : i32, i32
  }
  func.func @transform_1(%arg0: i32) -> (i32, i32) {
    %c0_i32 = arith.constant 0 : i32
    %c0_i32_0 = arith.constant 0 : i32
    %c0_i32_1 = arith.constant 0 : i32
    return %c0_i32, %c0_i32_0 : i32, i32
  }
  func.func @transform_2(%arg0: i32) -> (i32, i32) {
    %c0_i32 = arith.constant 0 : i32
    %c0_i32_0 = arith.constant 0 : i32
    %c0_i32_1 = arith.constant 0 : i32
    return %c0_i32, %c0_i32_0 : i32, i32
  }
  func.func @transform_3(%arg0: i32) -> (i32, i32) {
    %c0_i32 = arith.constant 0 : i32
    %c0_i32_0 = arith.constant 0 : i32
    return %arg0, %c0_i32 : i32, i32
  }
  func.func @transform_4(%arg0: i32) -> (i32, i32) {
    %c0_i32 = arith.constant 0 : i32
    %c0_i32_0 = arith.constant 0 : i32
    return %arg0, %c0_i32 : i32, i32
  }
}

</mosaic_0001>

<bundles_post_ra>
// kernel: tpu_custom_call.1
= control target key start
LH: loop header
LB: loop body
LE: loop exit
PB: predicated region body
PF: predicated region fallthrough
CT: control target
= control target key end

     0   :  { %10 = vsyncpa [#allocation3], 0  ;;  %s745_s0 = inlined_call_operand.hbm [shape: f32[3,16], index: 0, kind: input, shape index: {}]   ;;  %s746_s1 = inlined_call_operand.hbm [shape: f32[9,833], index: 1, kind: input, shape index: {}]   ;;  %s747_s2 = inlined_call_operand.hbm [shape: f32[9,128], index: 2, kind: input, shape index: {}]   ;;  %s748_s3 = inlined_call_operand.hbm [shape: f32[16,833], index: 3, kind: output, shape index: {0}]   ;;  %s749_s4 = inlined_call_operand.hbm [shape: f32[16,128], index: 4, kind: output, shape index: {1}]  }
   0x1   :  { %11 = vsyncpa [#allocation6], 0 }
   0x2   :  { %12 = vsyncpa [#allocation4], 0  ;;  %s29_s17 = sshll.u32 %s746_s1, 4  ;;  %s30_s17 = int_to_ptr.hbm [resolvable:$true] %s29_s17 }
   0x3   :  { %13 = vsyncpa [#allocation10], 0  ;;  %s645_s18 = smov [#allocation5]   ;;  %s19_s22 = sshll.u32 %s745_s0, 4  ;;  %s20_s22 = int_to_ptr.hbm [resolvable:$true] %s19_s22 }
   0x4   :  { %s31_s19 = sshll.u32 %s645_s18, 4  ;;  %s646_s23 = smov 896   ;;  %s32_s19 = int_to_ptr.vmem [resolvable:$true] %s31_s19 }
   0x5   :  { %s647_s24 = smov 56   ;;  %s648_s25 = smov [#allocation2]  }
   0x6   :  { %37 = dma.hbm_to_vmem [thread:$0]  %s30_s17, 1792, %s32_s19, [#allocation6], %s646_s23, %s646_s23, %s647_s24  }
   0x7   :  { %s21_s26 = sshll.u32 %s648_s25, 4  ;;  %s42_s28 = sshll.u32 %s747_s2, 4  ;;  %s22_s26 = int_to_ptr.vmem [resolvable:$true] %s21_s26  ;;  %s43_s28 = int_to_ptr.hbm [resolvable:$true] %s42_s28 }
   0x8   :  { %24 = dma.hbm_to_vmem [thread:$0]  %s20_s22, 64, %s22_s26, [#allocation3]  }
   0x9   :  { %s649_s29 = smov [#allocation7]   ;;  %s650_s0 = smov 128  }
   0xa   :  { %s44_s30 = sshll.u32 %s649_s29, 4  ;;  %s651_s5 = smov 8   ;;  %s45_s30 = int_to_ptr.vmem [resolvable:$true] %s44_s30 }
   0xb   :  { %50 = dma.hbm_to_vmem [thread:$0]  %s43_s28, 256, %s45_s30, [#allocation6], %s650_s0, %s650_s0, %s651_s5  }
   0xc   :  { %637 = dma.done.wait [#allocation3], 64  }
   0xd   :  { %638 = vsyncadd [#allocation3], 4294967232 }
   0xe   :  { %639 = dma.done.wait [#allocation6], 2048  }
   0xf   :  { %640 = vsyncadd [#allocation6], 4294965248  ;;  %v63_v0 = vld [vmem:[#allocation2] sm:$0x7]  ;;  %vm149_vm1 = vcmask 1040384   ;;  %v163_v15 = vld [vmem:[#allocation5] sm:$0xff] }
  0x10   :  { %v694_v1 = vmul.f32 %v63_v0, %v63_v0  ;;  %v108_v9 = vmul.f32 3.0, %v63_v0  ;;  %v170_v10 = vld [vmem:[#allocation5 + $0x38] sm:$0x1]  ;;  %v171_v11 = vld [vmem:[#allocation5 + $0x40] sm:$0x1]  ;;  %v164_v16 = vld [vmem:[#allocation5 + $0x8] sm:$0xff] }
  0x11   :  { %481 = vmatpush.msk.msra.mxu0 %vm149_vm1, %v170_v10  ;;  %484 = vmatpush.msk.msra.mxu1 %vm149_vm1, %v171_v11  ;;  %v172_v13 = vld [vmem:[#allocation5 + $0x48] sm:$0x1]  ;;  %v173_v14 = vld [vmem:[#allocation5 + $0x50] sm:$0x1]  ;;  %v166_v18 = vld [vmem:[#allocation5 + $0x18] sm:$0xff]  ;;  %v97_v24 = vrot.slane %v63_v0, 6 }
  0x12   :  { %v66_v2 = vrot.slane %v694_v1, 6  ;;  %v69_v3 = vrot.slane %v694_v1, 7  ;;  %487 = vmatpush.msk.msra.mxu2 %vm149_vm1, %v172_v13  ;;  %490 = vmatpush.msk.msra.mxu3 %vm149_vm1, %v173_v14  ;;  %v165_v17 = vld [vmem:[#allocation5 + $0x10] sm:$0xff]  ;;  %v109_v20 = vmul.f32 %v108_v9, %v63_v0  ;;  %v95_v23 = vmul.f32 1.0925485, %v63_v0  ;;  %v168_v9 = vld [vmem:[#allocation5 + $0x28] sm:$0xff] }
  0x13   :  { %252 = vmatpush.msra.mxu0 %v163_v15  ;;  %275 = vmatpush.msra.mxu1 %v164_v16  ;;  %v101_v25 = vrot.slane %v63_v0, 1  ;;  %v118_v26 = vrot.slane %v63_v0, 7  ;;  %v86_v30 = vmul.f32 0.48860252, %v63_v0  ;;  %vm151_vm5 = vcmask 1041408   ;;  %s652_s2 = smov [#allocation8]  }
  0x14   :  { %v68_v4 = vadd.f32 %v66_v2, %v694_v1  ;;  %298 = vmatpush.msra.mxu2 %v165_v17  ;;  %321 = vmatpush.msra.mxu3 %v166_v18  ;;  %v99_v31 = vmul.f32 %v97_v24, %v95_v23  ;;  %vm153_vm6 = vcmask 1042432   ;;  %v122_v52 = vsub.f32 %v694_v1, %v66_v2  ;;  %v176_v1 = vld [vmem:[#allocation5 + $0x68] sm:$0x1]  ;;  %v414_v2 = vld [vmem:[#allocation7 + $0x8] sm:$0x1]  ;;  %s447_s6 = sshll.u32 %s652_s2, 4  ;;  %s448_s6 = int_to_ptr.vmem [resolvable:$true] %s447_s6 }
  0x15   :  { %v103_v33 = vmul.f32 %v101_v25, %v95_v23  ;;  %v120_v34 = vmul.f32 %v118_v26, %v95_v23  ;;  %vm155_vm7 = vcmask 1043456   ;;  %vm157_vm8 = vcmask 1044480   ;;  %s449_s9 = sshll.u32 %s748_s3, 4  ;;  %s653_s10 = smov [#allocation9]   ;;  %s450_s9 = int_to_ptr.hbm [resolvable:$true] %s449_s9 }
  0x16   :  { %v71_v5 = vadd.f32 %v69_v3, %v68_v4  ;;  %vm159_vm9 = vcmask 1045504   ;;  %vm161_vm10 = vcmask 1046528   ;;  %v123_v60 = vmul.f32 0.54627424, %v122_v52  ;;  %v174_v4 = vld [vmem:[#allocation5 + $0x58] sm:$0x1]  ;;  %499 = vmatpush.msk.msrb.mxu2 %vm149_vm1, %v176_v1  ;;  %502 = vmatpush.msk.msrb.mxu3 %vm149_vm1, %v414_v2 }
  0x17   :  { %493 = vmatpush.msk.msrb.mxu0 %vm149_vm1, %v174_v4  ;;  %vm209_vm11 = vcmask 72704   ;;  %vm404_vm12 = vcmask 531456   ;;  %s460_s11 = sshll.u32 %s653_s10, 4  ;;  %s462_s14 = sshll.u32 %s749_s4, 4  ;;  %s461_s11 = int_to_ptr.vmem [resolvable:$true] %s460_s11  ;;  %s463_s14 = int_to_ptr.hbm [resolvable:$true] %s462_s14 }
  0x18   :  { %vm72_vm0 = vcmp.gt.f32.partialorder %v71_v5, 0.0  ;;  %v111_v21 = vrot.slane %v71_v5, 1 }
  0x19   :  { %v73_v6 = vsel %vm72_vm0, %v71_v5, 1.0  ;;  %v175_v5 = vld [vmem:[#allocation5 + $0x60] sm:$0x1] }
  0x1a   :  { %515 = vrsqrt.f32 %v73_v6  ;;  %vm80_vm2 = vweird.f32 %v73_v6  ;;  %v113_v28 = vsub.f32 %v109_v20, %v111_v21  ;;  %496 = vmatpush.msk.msrb.mxu1 %vm149_vm1, %v175_v5 }
  0x1c   :  { %v114_v39 = vmul.f32 0.31539157, %v113_v28  ;;  %367 = vmatpush.msrb.mxu1 %v168_v9 }
  0x20   :  { %v516_v7 = vpop.eup %515 }
  0x21   :  { %v75_v8 = vmul.f32 %v516_v7, %v73_v6  ;;  %vm81_vm3 = vweird.f32 %v516_v7  ;;  %v169_v6 = vld [vmem:[#allocation5 + $0x30] sm:$0xff] }
  0x22   :  { %vm82_vm4 = vmor %vm80_vm2, %vm81_vm3  ;;  %390 = vmatpush.msrb.mxu2 %v169_v6 }
  0x23   :  { %v76_v12 = vmul.f32 %v516_v7, %v75_v8  ;;  %v167_v8 = vld [vmem:[#allocation5 + $0x20] sm:$0xff] }
  0x24   :  { %344 = vmatpush.msrb.mxu0 %v167_v8 }
  0x25   :  { %v77_v19 = vmul.f32 0.5, %v76_v12 }
  0x27   :  { %v78_v22 = vsub.f32 1.5, %v77_v19 }
  0x29   :  { %v79_v27 = vmul.f32 %v516_v7, %v78_v22 }
  0x2b   :  { %v83_v29 = vsel %vm82_vm4, %v516_v7, %v79_v27  ;;  %v413_v7 = vld [vmem:[#allocation7] sm:$0xff] }
  0x2c   :  { %v84_v32 = vsel %vm72_vm0, %v83_v29, 0.0  ;;  %433 = vmatpush.msrb.mxu3 %v413_v7 }
  0x2d   :  { %v85_v35 = vmul.f32 %v84_v32, %v84_v32  ;;  %v88_v36 = vrot.slane %v84_v32, 2  ;;  %v91_v37 = vrot.slane %v84_v32, 1  ;;  %v94_v38 = vmul.f32 %v86_v30, %v84_v32 }
  0x2f   :  { %v90_v40 = vmul.f32 %v88_v36, %v86_v30  ;;  %v93_v41 = vmul.f32 %v91_v37, %v86_v30  ;;  %v100_v42 = vmul.f32 %v99_v31, %v85_v35  ;;  %v105_v43 = vrot.slane %v85_v35, 2 }
  0x30   :  { %v115_v44 = vrot.slane %v85_v35, 1  ;;  %v121_v45 = vmul.f32 %v120_v34, %v85_v35  ;;  %v132_v49 = vrot.slane %v94_v38, 7  ;;  %v124_v0 = vmul.f32 %v123_v60, %v85_v35 }
  0x31   :  { %v107_v46 = vmul.f32 %v105_v43, %v103_v33  ;;  %v126_v47 = vrot.slane %v90_v40, 7  ;;  %v129_v48 = vrot.slane %v93_v41, 7  ;;  %v135_v51 = vrot.slane %v100_v42, 6 }
  0x32   :  { %v117_v50 = vmul.f32 %v115_v44, %v114_v39  ;;  %v144_v57 = vrot.slane %v121_v45, 3  ;;  %v147_v3 = vrot.slane %v124_v0, 2 }
  0x33   :  { %v138_v53 = vrot.slane %v107_v46, 3  ;;  %v150_v54 = vsel %vm149_vm1, 0.2820948, %v126_v47 }
  0x34   :  { %v141_v55 = vrot.slane %v117_v50, 3  ;;  %v152_v56 = vsel %vm151_vm5, %v150_v54, %v129_v48 }
  0x35   :  { %v154_v58 = vsel %vm153_vm6, %v152_v56, %v132_v49 }
  0x36   :  { %v156_v59 = vsel %vm155_vm7, %v154_v58, %v135_v51 }
  0x37   :  { %v158_v61 = vsel %vm157_vm8, %v156_v59, %v138_v53 }
  0x38   :  { %v160_v62 = vsel %vm159_vm9, %v158_v61, %v141_v55 }
  0x39   :  { %v162_v63 = vsel %vm161_vm10, %v160_v62, %v144_v57 }
  0x3a   :  { %177 = vxpose.xlu0.b32.start [1/2] (short) (narrow) %v162_v63, 16 }
  0x42   :  { %178 = vxpose.xlu0.b32.end [2/2] (short) (narrow) %v147_v3, 16 }
  0xde   :  { %v193_v10 = vpop.trf.xlu0 }
  0xdf   :  { %482 = vmatmul.msk.f32.vlgmr.msra.gmra.mxu0 %vm209_vm11, %v193_v10  ;;  %485 = vmatmul.msk.f32.vlgmr.msra.gmra.mxu1 %vm209_vm11, %v193_v10 }
  0xe0   :  { %488 = vmatmul.msk.f32.vlgmr.msra.gmra.mxu2 %vm209_vm11, %v193_v10  ;;  %491 = vmatmul.msk.f32.vlgmr.msra.gmra.mxu3 %vm209_vm11, %v193_v10 }
  0xe6   :  { %v194_v11 = vpop.trf.xlu0 }
  0xe7   :  { %483 = vmatmul.msk.f32.gmra.mxu0 %vm209_vm11, %v194_v11  ;;  %486 = vmatmul.msk.f32.gmra.mxu1 %vm209_vm11, %v194_v11 }
  0xe8   :  { %489 = vmatmul.msk.f32.gmra.mxu2 %vm209_vm11, %v194_v11  ;;  %492 = vmatmul.msk.f32.gmra.mxu3 %vm209_vm11, %v194_v11 }
  0xef   :  { %494 = vmatmul.msk.f32.vlgmr.msrb.gmra.mxu0 %vm209_vm11, %v193_v10  ;;  %497 = vmatmul.msk.f32.vlgmr.msrb.gmra.mxu1 %vm209_vm11, %v193_v10 }
  0xf0   :  { %500 = vmatmul.msk.f32.vlgmr.msrb.gmra.mxu2 %vm209_vm11, %v193_v10  ;;  %503 = vmatmul.msk.f32.vlgmr.msrb.gmra.mxu3 %vm209_vm11, %v193_v10 }
  0xf7   :  { %495 = vmatmul.msk.f32.gmra.mxu0 %vm209_vm11, %v194_v11  ;;  %498 = vmatmul.msk.f32.gmra.mxu1 %vm209_vm11, %v194_v11 }
  0xf8   :  { %501 = vmatmul.msk.f32.gmra.mxu2 %vm209_vm11, %v194_v11  ;;  %504 = vmatmul.msk.f32.gmra.mxu3 %vm209_vm11, %v194_v11 }
 0x15c   :  { %v254_v12 = vpop.f32.mrf.mxu0  ;;  %v277_v13 = vpop.f32.mrf.mxu1 }
 0x15d   :  { %398 = vst [vmem:[#allocation8] sm:$0xff] %v254_v12 }
 0x15e   :  { %399 = vst [vmem:[#allocation8 + $0x8] sm:$0xff] %v277_v13 }
 0x163   :  { %v300_v14 = vpop.f32.mrf.mxu2  ;;  %v323_v15 = vpop.f32.mrf.mxu3 }
 0x164   :  { %400 = vst [vmem:[#allocation8 + $0x10] sm:$0xff] %v300_v14  ;;  %v257_v16 = vpop.f32.mrf.mxu0  ;;  %v280_v17 = vpop.f32.mrf.mxu1 }
 0x165   :  { %401 = vst [vmem:[#allocation8 + $0x18] sm:$0xff] %v323_v15 }
 0x166   :  { %406 = vst [vmem:[#allocation8 + $0x38] sm:$0xff] %v257_v16 }
 0x167   :  { %407 = vst [vmem:[#allocation8 + $0x40] sm:$0xff] %v280_v17 }
 0x16b   :  { %v303_v18 = vpop.f32.mrf.mxu2  ;;  %v326_v19 = vpop.f32.mrf.mxu3 }
 0x16c   :  { %408 = vst [vmem:[#allocation8 + $0x48] sm:$0xff] %v303_v18  ;;  %v346_v20 = vpop.f32.mrf.mxu0  ;;  %v369_v21 = vpop.f32.mrf.mxu1 }
 0x16d   :  { %409 = vst [vmem:[#allocation8 + $0x50] sm:$0xff] %v326_v19 }
 0x16e   :  { %402 = vst [vmem:[#allocation8 + $0x20] sm:$0xff] %v346_v20 }
 0x16f   :  { %403 = vst [vmem:[#allocation8 + $0x28] sm:$0xff] %v369_v21 }
 0x173   :  { %v392_v22 = vpop.f32.mrf.mxu2  ;;  %v435_v23 = vpop.f32.mrf.mxu3 }
 0x174   :  { %405 = vst.msk [vmem:[#allocation8 + $0x30] sm:$0xff] %vm404_vm12, %v392_v22  ;;  %v349_v24 = vpop.f32.mrf.mxu0  ;;  %v372_v25 = vpop.f32.mrf.mxu1 }
 0x175   :  { %441 = vst [vmem:[#allocation9] sm:$0xff] %v435_v23 }
 0x176   :  { %410 = vst [vmem:[#allocation8 + $0x58] sm:$0xff] %v349_v24 }
 0x177   :  { %411 = vst [vmem:[#allocation8 + $0x60] sm:$0xff] %v372_v25 }
 0x17b   :  { %v395_v26 = vpop.f32.mrf.mxu2  ;;  %v438_v27 = vpop.f32.mrf.mxu3 }
 0x17c   :  { %412 = vst.msk [vmem:[#allocation8 + $0x68] sm:$0xff] %vm404_vm12, %v395_v26 }
 0x17d   :  { %442 = vst [vmem:[#allocation9 + $0x8] sm:$0xff] %v438_v27  ;;  %455 = dma.vmem_to_hbm [thread:$0]  %s448_s6, 1792, %s450_s9, [#allocation4], %s646_s23, %s646_s23, %s647_s24  }
 0x17e   :  { %468 = dma.vmem_to_hbm [thread:$0]  %s461_s11, 256, %s463_s14, [#allocation10], %s650_s0, %s650_s0, %s651_s5  }
 0x17f   :  { %641 = dma.done.wait [#allocation4], 1792  }
 0x180   :  { %642 = vsyncadd [#allocation4], 4294965504 }
 0x181   :  { %643 = dma.done.wait [#allocation10], 256  }
 0x182   :  { %644 = vsyncadd [#allocation10], 4294967040 }
 0x183   :  { %477 = vsyncpa [#allocation3], 1 }
 0x184   :  { %478 = vsyncpa [#allocation6], 1 }
 0x185   :  { %479 = vsyncpa [#allocation4], 1 }
 0x186   :  { %480 = vsyncpa [#allocation10], 1 }

</bundles_post_ra>
